<compile_context>
chip_gen: v7x
topology: tpu7x:2x2x1
jax: 0.10.0
libtpu: 0.0.40
codegen_flags: <defaults>
</compile_context>

<pallas_src>
import functools

import jax
import jax.numpy as jnp
from jax.experimental import pallas as pl
from jax.experimental.pallas import tpu as pltpu


def classifier_kernel(x_ref, w_ref, b_ref, o_ref):
    # (TB, 16) @ (16, N) on the MXU with f32 accumulation, + broadcast bias.
    acc = jnp.dot(x_ref[...], w_ref[...], preferred_element_type=jnp.float32)
    o_ref[...] = (acc + b_ref[...]).astype(o_ref.dtype)


def _round_up(v, m):
    return ((v + m - 1) // m) * m


@functools.partial(jax.jit, static_argnames=("block_rows",))
def classifier_forward(x, w, b, *, block_rows=1024):
    """Pallas implementation of Classifier.forward.

    x: (B, ...) flattening to (B, 16)
    w: (num_classes, 16)   -- PyTorch nn.Linear weight layout
    b: (num_classes,)      -- nn.Linear bias
    returns: (B, num_classes)
    """
    B = x.shape[0]
    xf = x.reshape(B, -1)
    D = xf.shape[1]
    N = w.shape[0]

    # nn.Linear layout -> (D, N) for a plain x @ W matmul; bias as (1, N).
    wt = jnp.transpose(w)
    bp = b.reshape(1, N)

    # Batch-tile selection:
    #   * small B: a single full-extent block (block dims equal to the array
    #     dims are always legal, no sublane-divisibility requirement).
    #   * larger B: rows-per-step is a multiple of 8 sublanes; the number of
    #     steps is balanced so v7x's two TensorCores each get ~equal work.
    # No explicit padding anywhere: the ragged final block is handled by
    # Pallas (masked output writeback; OOB input rows only feed OOB outputs).
    if B >= 512:
        num_steps = max(pl.cdiv(B, block_rows), 2)
        TB = _round_up(pl.cdiv(B, num_steps), 8)
    else:
        TB = B

    grid = (pl.cdiv(B, TB),)

    itemsize = jnp.dtype(x.dtype).itemsize
    cost = pl.CostEstimate(
        flops=2 * B * D * N,
        transcendentals=0,
        bytes_accessed=(B * (D + N) + D * N + N) * itemsize,
    )

    out = pl.pallas_call(
        classifier_kernel,
        out_shape=jax.ShapeDtypeStruct((B, N), x.dtype),
        grid=grid,
        in_specs=[
            pl.BlockSpec((TB, D), lambda i: (i, 0)),   # x rows, tiled over batch
            pl.BlockSpec((D, N), lambda i: (0, 0)),    # weight, resident
            pl.BlockSpec((1, N), lambda i: (0, 0)),    # bias, resident
        ],
        out_specs=pl.BlockSpec((TB, N), lambda i: (i, 0)),
        compiler_params=pltpu.CompilerParams(
            dimension_semantics=("parallel",),
        ),
        cost_estimate=cost,
    )(xf, wt, bp)

    return out


def _reference(x, w, b):
    B = x.shape[0]
    xf = x.reshape(B, -1)
    return xf @ w.T + b


if __name__ == "__main__":
    key = jax.random.PRNGKey(0)
    kx, kw, kb, kx2 = jax.random.split(key, 4)

    num_classes = 10

    # Small shape consistent with the module: flatten(x) must be (B, 16).
    B = 2
    x = jax.random.normal(kx, (B, 4, 4), dtype=jnp.float32)          # -> (2, 16)
    w = 0.1 * jax.random.normal(kw, (num_classes, 16), dtype=jnp.float32)
    b = 0.1 * jax.random.normal(kb, (num_classes,), dtype=jnp.float32)

    out = classifier_forward(x, w, b)
    out = jax.block_until_ready(out)
    ref = _reference(x, w, b)
    assert out.shape == (B, num_classes)
    assert jnp.allclose(out, ref, rtol=1e-5, atol=1e-5), "mismatch (small batch)"

    # Second check: batch large enough to exercise the tiled / ragged-block path
    # (B=1037 -> 2 balanced grid steps, final block partially out of bounds).
    B2 = 1037
    x2 = jax.random.normal(kx2, (B2, 16), dtype=jnp.float32)
    out2 = classifier_forward(x2, w, b)
    out2 = jax.block_until_ready(out2)
    ref2 = _reference(x2, w, b)
    assert out2.shape == (B2, num_classes)
    assert jnp.allclose(out2, ref2, rtol=1e-5, atol=1e-5), "mismatch (tiled batch)"

    print("KERNEL_OK")
</pallas_src>

<mosaic_0001>
module attributes {stable_mosaic.version = 11 : i64} {
  func.func @classifier_kernel(%arg0: i32, %arg1: memref<2x16xf32, #tpu.memory_space<vmem>>, %arg2: memref<16x10xf32, #tpu.memory_space<vmem>>, %arg3: memref<1x10xf32, #tpu.memory_space<vmem>>, %arg4: memref<2x10xf32, #tpu.memory_space<vmem>>) attributes {dimension_semantics = [#tpu.dimension_semantics<parallel>], iteration_bounds = array<i64: 1>, scalar_prefetch = 0 : i64, scratch_operands = 0 : i64, tpu.core_type = #tpu.core_type<tc>, window_params = [{transform_indices = @transform_0, window_bounds = array<i64: 2, 16>}, {pipeline_mode = #tpu.pipeline_mode<synchronous>, transform_indices = @transform_1, window_bounds = array<i64: 16, 10>}, {pipeline_mode = #tpu.pipeline_mode<synchronous>, transform_indices = @transform_2, window_bounds = array<i64: 1, 10>}, {transform_indices = @transform_3, window_bounds = array<i64: 2, 10>}]} {
    %c0 = arith.constant 0 : index
    %c0_0 = arith.constant 0 : index
    %0 = vector.load %arg1[%c0, %c0_0] : memref<2x16xf32, #tpu.memory_space<vmem>>, vector<2x16xf32>
    %c0_1 = arith.constant 0 : index
    %c0_2 = arith.constant 0 : index
    %1 = vector.load %arg2[%c0_1, %c0_2] : memref<16x10xf32, #tpu.memory_space<vmem>>, vector<16x10xf32>
    %cst = arith.constant dense<0.000000e+00> : vector<2x10xf32>
    %2 = tpu.matmul %0, %1, %cst {dimension_numbers = #tpu.dot_dimension_numbers<[1], [0], [0], [1], [0, 0, 1, 1], [], []>} : vector<2x16xf32>, vector<16x10xf32>, vector<2x10xf32> -> vector<2x10xf32>
    %c0_3 = arith.constant 0 : index
    %c0_4 = arith.constant 0 : index
    %3 = vector.load %arg3[%c0_3, %c0_4] : memref<1x10xf32, #tpu.memory_space<vmem>>, vector<1x10xf32>
    %4 = vector.broadcast %3 : vector<1x10xf32> to vector<2x10xf32>
    %5 = arith.addf %2, %4 : vector<2x10xf32>
    %c0_5 = arith.constant 0 : index
    %c0_6 = arith.constant 0 : index
    %6 = vector.load %arg4[%c0_5, %c0_6] : memref<2x10xf32, #tpu.memory_space<vmem>>, vector<2x10xf32>
    tpu.vector_store %arg4[%c0_5, %c0_6], %5 {strides = array<i32>} : memref<2x10xf32, #tpu.memory_space<vmem>>, vector<2x10xf32>,
    return
  }
  func.func @transform_0(%arg0: i32) -> (i32, i32) {
    %c0_i32 = arith.constant 0 : i32
    %c0_i32_0 = arith.constant 0 : i32
    return %arg0, %c0_i32 : i32, i32
  }
  func.func @transform_1(%arg0: i32) -> (i32, i32) {
    %c0_i32 = arith.constant 0 : i32
    %c0_i32_0 = arith.constant 0 : i32
    %c0_i32_1 = arith.constant 0 : i32
    return %c0_i32, %c0_i32_0 : i32, i32
  }
  func.func @transform_2(%arg0: i32) -> (i32, i32) {
    %c0_i32 = arith.constant 0 : i32
    %c0_i32_0 = arith.constant 0 : i32
    %c0_i32_1 = arith.constant 0 : i32
    return %c0_i32, %c0_i32_0 : i32, i32
  }
  func.func @transform_3(%arg0: i32) -> (i32, i32) {
    %c0_i32 = arith.constant 0 : i32
    %c0_i32_0 = arith.constant 0 : i32
    return %arg0, %c0_i32 : i32, i32
  }
}

</mosaic_0001>

<bundles_post_ra>
// kernel: classifier_forward.1
= control target key start
LH: loop header
LB: loop body
LE: loop exit
PB: predicated region body
PF: predicated region fallthrough
CT: control target
= control target key end

     0   :  { %v158_v2 = vmov 0.0|0.0   ;;  %vm159_vm0 = vmmov 0   ;;  %v160_v4 = vmov 0.0   ;;  %s206_s0 = inlined_call_operand.vmem [shape: f32[2,16], index: 0, kind: input, shape index: {}]   ;;  %s207_s1 = inlined_call_operand.vmem [shape: f32[16,10], index: 1, kind: input, shape index: {}]   ;;  %s208_s2 = inlined_call_operand.vmem [shape: f32[1,10], index: 2, kind: input, shape index: {}]   ;;  %s209_s3 = inlined_call_operand.hbm [shape: f32[2,10], index: 3, kind: output, shape index: {}]  }
   0x1   :  { %v16_v0 = vld [vmem:[%s207_s1] sm:$0xff]  ;;  %v17_v1 = vld [vmem:[%s207_s1 + $0x8] sm:$0xff]  ;;  %127 = vmatprep.subr.bf16.mxu0 %v158_v2  ;;  %124 = vmatprep.mubr.msk.f32.mxu0 %vm159_vm0, %v160_v4 }
   0x2   :  { %v128_v3 = vpack.c.bf16 %v17_v1, %v16_v0 }
   0x3   :  { %8 = vsyncpa [#allocation3], 0  ;;  %v15_v5 = vld [vmem:[%s206_s0] sm:$0x3]  ;;  %vm25_vm1 = vcmask 130048   ;;  %s161_s20 = smov [#allocation2]  }
   0x4   :  { %129 = vmatpush3.bf16.msra.mxu0 %v128_v3  ;;  %v115_v6 = vld [vmem:[%s208_s2] ss:$0 sm:$0xff]  ;;  %s107_s1 = sshll.u32 %s161_s20, 4  ;;  %vm99_vm2 = vcmask 74752   ;;  %s108_s1 = int_to_ptr.vmem [resolvable:$true] %s107_s1 }
   0x5   :  { %s134_s21 = scalar_lea.vmem %s108_s1, 32  ;;  %p139_p1 = scmp.lt.s32.totalorder %s108_s1, %s108_s1 }
   0x6   :  { %p135_p0 = scmp.ne.s32.totalorder %s108_s1, %s134_s21  ;;  %p140_p2 = scmp.lt.s32.totalorder %s134_s21, %s134_s21 }
   0x7   :  { %125 = vmatmul.mubr.msk.f32.vlgmr.msra.gmra.mrb[0].mxu0 %vm25_vm1, %v15_v5 }
   0x8   :  { %p141_p3 = por %p140_p2, %p139_p1 }
   0xa   :  { %p142_p4 = pnand %p141_p3, %p135_p0 }
  0xda   :  { %v95_v7 = vpop.f32.mrb[0].mxu0 }
  0xdb   :  { %v96_v8 = vadd.f32 %v115_v6, %v95_v7  ;;  %v126_v9 = vpop.f32.mrb[1].mxu0 }
  0xdd   :  { %100 = vst.msk [vmem:[#allocation2] sm:$0x3] %vm99_vm2, %v96_v8 }
  0xde   :  { %145 = shalt.err (!%p142_p4)
}
  0xdf   :  { %s146_s23 = scalar_lea.hbm %s209_s3, 32 }
  0xe0   :  { %p147_p5 = scmp.ne.s32.totalorder %s209_s3, %s146_s23  ;;  %p150_p6 = scmp.lt.u32.totalorder %s146_s23, %s209_s3 }
  0xe2   :  { %p152_p7 = pnand %p150_p6, %p147_p5 }
  0xe4   :  { %155 = shalt.err (!%p152_p7)
}
  0xe5   :  { %110 = dma.vmem_to_hbm [thread:$0]  %s108_s1, 32, %s209_s3, [#allocation3]  }
  0xe6   :  { %156 = dma.done.wait [#allocation3], 32  }
  0xe7   :  { %157 = vsyncadd [#allocation3], 4294967264 }
  0xe8   :  { %114 = vsyncpa [#allocation3], 1 }

</bundles_post_ra>
